<compile_context>
chip_gen: v7x
topology: tpu7x:2x2x1
jax: 0.10.0
libtpu: 0.0.40
codegen_flags: <defaults>
</compile_context>

<pallas_src>
import functools

import jax
import jax.numpy as jnp
import numpy as np
from jax.experimental import pallas as pl
from jax.experimental.pallas import tpu as pltpu


# ----------------------------------------------------------------------------
# Kernel: per cutout k:  out[k] = 0.5*(avg_pool(x) + max_pool(x)) + facs[k]*noise[k]
# ----------------------------------------------------------------------------
def _make_cutouts_kernel(facs_ref, x_ref, noise_ref, o_ref, *, cut, kh, kw):
    """facs_ref: (cutn,) f32 in SMEM; x_ref: (C, H, W) f32 resident in VMEM;
    noise_ref / o_ref: (1, C, cut, cut) f32 blocks for cutout k."""
    k = pl.program_id(0)
    x = x_ref[...]                               # (C, H, W) float32
    C = x.shape[0]
    W = x.shape[2]
    inv_area = 1.0 / float(kh * kw)

    # ---- pool along H: group rows into `cut` windows of kh (tile-aligned) ----
    # row a = c*cut + i, window element t  ->  x[c, i*kh + t, :]
    xr = x.reshape(C * cut, kh, W)
    r_sum = jnp.sum(xr, axis=1)                  # (C*cut, W)
    r_max = jnp.max(xr, axis=1)                  # (C*cut, W)

    # ---- pool along W: transpose, then the same sublane-window trick --------
    s_t = r_sum.T.reshape(cut, kw, C * cut)      # [j, s, a] = r_sum[a, j*kw + s]
    m_t = r_max.T.reshape(cut, kw, C * cut)
    c_sum = jnp.sum(s_t, axis=1)                 # (cut_j, C*cut_i)
    c_max = jnp.max(m_t, axis=1)                 # (cut_j, C*cut_i)

    pooled_t = 0.5 * (c_sum * inv_area + c_max)  # (cut_j, C*cut_i)
    pooled = pooled_t.T.reshape(C, cut, cut)     # (C, cut_i, cut_j)

    o_ref[0] = pooled + facs_ref[k] * noise_ref[0]


def make_cutouts_pallas(x, facs, noise, *, cut_size):
    """x: (1, C, H, W) f32;  facs: (cutn,) f32;  noise: (cutn, C, cut, cut) f32."""
    N, C, H, W = x.shape
    assert N == 1, "facs broadcasting in the reference module requires batch=1"
    # TODO(synk): non-divisible adaptive-pool windows (H or W not a multiple of
    # cut_size) are not implemented; the uniform-window case below is exact.
    assert H % cut_size == 0 and W % cut_size == 0
    cutn = facs.shape[0]
    kh, kw = H // cut_size, W // cut_size
    kernel = functools.partial(_make_cutouts_kernel, cut=cut_size, kh=kh, kw=kw)
    return pl.pallas_call(
        kernel,
        out_shape=jax.ShapeDtypeStruct((cutn, C, cut_size, cut_size), jnp.float32),
        grid=(cutn,),
        in_specs=[
            pl.BlockSpec(memory_space=pltpu.MemorySpace.SMEM),          # facs
            pl.BlockSpec((C, H, W), lambda k: (0, 0, 0)),               # x (resident)
            pl.BlockSpec((1, C, cut_size, cut_size), lambda k: (k, 0, 0, 0)),
        ],
        out_specs=pl.BlockSpec((1, C, cut_size, cut_size), lambda k: (k, 0, 0, 0)),
        compiler_params=pltpu.CompilerParams(dimension_semantics=("parallel",)),
    )(facs, x[0], noise)


# ----------------------------------------------------------------------------
# Module-equivalent forward
# ----------------------------------------------------------------------------
def make_cutouts_forward(x, *, cut_size, cutn, cut_pow=1.0, noise_fac=0.1, key=None):
    # cut_pow is stored by the reference module but never used in its forward.
    del cut_pow
    N, C, H, W = x.shape
    if noise_fac:
        k_fac, k_noise = jax.random.split(key)
        facs = jax.random.uniform(k_fac, (cutn,), dtype=jnp.float32,
                                  minval=0.0, maxval=noise_fac)
        noise = jax.random.normal(k_noise, (cutn * N, C, cut_size, cut_size),
                                  dtype=jnp.float32)
    else:
        facs = jnp.zeros((cutn,), jnp.float32)
        noise = jnp.zeros((cutn * N, C, cut_size, cut_size), jnp.float32)
    # TODO(synk): the kornia augmentation pipeline (self.augs, driven by
    # args.augments) is stochastic and config-dependent; treated as identity
    # (empty augment list).
    out = make_cutouts_pallas(x, facs, noise, cut_size=cut_size)
    return out, (facs, noise)


if __name__ == "__main__":
    cut_size = 8      # stands in for perceptor.visual.input_resolution (small)
    cutn = 4
    noise_fac = 0.1

    key = jax.random.PRNGKey(0)
    k_img, k_fwd = jax.random.split(key)
    C, H, W = 3, 64, 128
    x = jax.random.uniform(k_img, (1, C, H, W), dtype=jnp.float32)

    out, (facs, noise) = make_cutouts_forward(
        x, cut_size=cut_size, cutn=cutn, cut_pow=1.0,
        noise_fac=noise_fac, key=k_fwd)
    out = jax.block_until_ready(out)
    assert out.shape == (cutn * 1, C, cut_size, cut_size)

    # Plain numpy reference: (adaptive avg pool + adaptive max pool)/2 (uniform
    # windows since H, W are multiples of cut_size), tiled cutn times, + noise.
    xn = np.asarray(x)[0]                                   # (C, H, W)
    kh, kw = H // cut_size, W // cut_size
    xr = xn.reshape(C, cut_size, kh, cut_size, kw)
    pooled_ref = 0.5 * (xr.mean(axis=(2, 4)) + xr.max(axis=(2, 4)))
    ref = pooled_ref[None] + np.asarray(facs)[:, None, None, None] * np.asarray(noise)
    np.testing.assert_allclose(np.asarray(out), ref, rtol=1e-4, atol=1e-4)

    print("KERNEL_OK")
</pallas_src>

<mosaic_0001>
module attributes {stable_mosaic.version = 11 : i64} {
  func.func @_make_cutouts_kernel(%arg0: i32, %arg1: memref<4xf32, #tpu.memory_space<smem>>, %arg2: memref<3x64x128xf32, #tpu.memory_space<vmem>>, %arg3: memref<1x3x8x8xf32, #tpu.memory_space<vmem>>, %arg4: memref<1x3x8x8xf32, #tpu.memory_space<vmem>>) attributes {dimension_semantics = [#tpu.dimension_semantics<parallel>], iteration_bounds = array<i64: 4>, scalar_prefetch = 0 : i64, scratch_operands = 0 : i64, tpu.core_type = #tpu.core_type<tc>, window_params = [{transform_indices = @transform_0, window_bounds = array<i64: 4>}, {pipeline_mode = #tpu.pipeline_mode<synchronous>, transform_indices = @transform_1, window_bounds = array<i64: 3, 64, 128>}, {transform_indices = @transform_2, window_bounds = array<i64: 1, 3, 8, 8>}, {transform_indices = @transform_3, window_bounds = array<i64: 1, 3, 8, 8>}]} {
    %c0 = arith.constant 0 : index
    %c0_0 = arith.constant 0 : index
    %c0_1 = arith.constant 0 : index
    %0 = vector.load %arg2[%c0, %c0_0, %c0_1] : memref<3x64x128xf32, #tpu.memory_space<vmem>>, vector<3x64x128xf32>
    %1 = vector.shape_cast %0 : vector<3x64x128xf32> to vector<24x8x128xf32>
    %cst = arith.constant dense<0.000000e+00> : vector<24x128xf32>
    %2 = vector.multi_reduction <add>, %1, %cst [1] : vector<24x8x128xf32> to vector<24x128xf32>
    %cst_2 = arith.constant dense<0xFF800000> : vector<24x128xf32>
    %3 = vector.multi_reduction <maximumf>, %1, %cst_2 [1] : vector<24x8x128xf32> to vector<24x128xf32>
    %4 = tpu.transpose %2, [1, 0] : vector<24x128xf32> -> vector<128x24xf32>
    %5 = vector.shape_cast %4 : vector<128x24xf32> to vector<8x16x24xf32>
    %6 = tpu.transpose %3, [1, 0] : vector<24x128xf32> -> vector<128x24xf32>
    %7 = vector.shape_cast %6 : vector<128x24xf32> to vector<8x16x24xf32>
    %cst_3 = arith.constant dense<0.000000e+00> : vector<8x24xf32>
    %8 = vector.multi_reduction <add>, %5, %cst_3 [1] : vector<8x16x24xf32> to vector<8x24xf32>
    %cst_4 = arith.constant dense<0xFF800000> : vector<8x24xf32>
    %9 = vector.multi_reduction <maximumf>, %7, %cst_4 [1] : vector<8x16x24xf32> to vector<8x24xf32>
    %cst_5 = arith.constant 7.812500e-03 : f32
    %10 = vector.broadcast %cst_5 : f32 to vector<8x24xf32>
    %11 = arith.mulf %8, %10 : vector<8x24xf32>
    %12 = arith.addf %11, %9 : vector<8x24xf32>
    %cst_6 = arith.constant 5.000000e-01 : f32
    %13 = vector.broadcast %cst_6 : f32 to vector<8x24xf32>
    %14 = arith.mulf %13, %12 : vector<8x24xf32>
    %15 = tpu.transpose %14, [1, 0] : vector<8x24xf32> -> vector<24x8xf32>
    %16 = vector.shape_cast %15 : vector<24x8xf32> to vector<3x8x8xf32>
    %17 = arith.index_cast %arg0 : i32 to index
    %18 = memref.load %arg1[%17] : memref<4xf32, #tpu.memory_space<smem>>
    %c0_7 = arith.constant 0 : index
    %c0_8 = arith.constant 0 : index
    %c0_9 = arith.constant 0 : index
    %c0_10 = arith.constant 0 : index
    %19 = vector.load %arg3[%c0_7, %c0_8, %c0_9, %c0_10] : memref<1x3x8x8xf32, #tpu.memory_space<vmem>>, vector<1x3x8x8xf32>
    %20 = vector.shape_cast %19 : vector<1x3x8x8xf32> to vector<3x8x8xf32>
    %21 = vector.broadcast %18 : f32 to vector<3x8x8xf32>
    %22 = arith.mulf %21, %20 : vector<3x8x8xf32>
    %23 = arith.addf %16, %22 : vector<3x8x8xf32>
    %c0_11 = arith.constant 0 : index
    %c0_12 = arith.constant 0 : index
    %c0_13 = arith.constant 0 : index
    %c0_14 = arith.constant 0 : index
    %24 = vector.load %arg4[%c0_11, %c0_12, %c0_13, %c0_14] : memref<1x3x8x8xf32, #tpu.memory_space<vmem>>, vector<1x3x8x8xf32>
    %25 = vector.shape_cast %24 : vector<1x3x8x8xf32> to vector<3x8x8xf32>
    %26 = vector.shape_cast %23 : vector<3x8x8xf32> to vector<1x3x8x8xf32>
    tpu.vector_store %arg4[%c0_11, %c0_12, %c0_13, %c0_14], %26 {strides = array<i32>} : memref<1x3x8x8xf32, #tpu.memory_space<vmem>>, vector<1x3x8x8xf32>,
    return
  }
  func.func @transform_0(%arg0: i32) -> i32 {
    %c0_i32 = arith.constant 0 : i32
    %c0_i32_0 = arith.constant 0 : i32
    return %c0_i32 : i32
  }
  func.func @transform_1(%arg0: i32) -> (i32, i32, i32) {
    %c0_i32 = arith.constant 0 : i32
    %c0_i32_0 = arith.constant 0 : i32
    %c0_i32_1 = arith.constant 0 : i32
    %c0_i32_2 = arith.constant 0 : i32
    return %c0_i32, %c0_i32_0, %c0_i32_1 : i32, i32, i32
  }
  func.func @transform_2(%arg0: i32) -> (i32, i32, i32, i32) {
    %c0_i32 = arith.constant 0 : i32
    %c0_i32_0 = arith.constant 0 : i32
    %c0_i32_1 = arith.constant 0 : i32
    %c0_i32_2 = arith.constant 0 : i32
    return %arg0, %c0_i32, %c0_i32_0, %c0_i32_1 : i32, i32, i32, i32
  }
  func.func @transform_3(%arg0: i32) -> (i32, i32, i32, i32) {
    %c0_i32 = arith.constant 0 : i32
    %c0_i32_0 = arith.constant 0 : i32
    %c0_i32_1 = arith.constant 0 : i32
    %c0_i32_2 = arith.constant 0 : i32
    return %arg0, %c0_i32, %c0_i32_0, %c0_i32_1 : i32, i32, i32, i32
  }
}

</mosaic_0001>

<bundles_post_ra>
// kernel: tpu_custom_call.1
= control target key start
LH: loop header
LB: loop body
LE: loop exit
PB: predicated region body
PF: predicated region fallthrough
CT: control target
= control target key end

     0   :  { %8 = vsyncpa [#allocation5], 0  ;;  %s1790_s0 = inlined_call_operand.hbm [shape: f32[4], index: 0, kind: input, shape index: {}]   ;;  %s1791_s1 = inlined_call_operand.hbm [shape: f32[3,64,128], index: 1, kind: input, shape index: {}]   ;;  %s1792_s2 = inlined_call_operand.hbm [shape: f32[4,3,8,8], index: 2, kind: input, shape index: {}]   ;;  %s1793_s3 = inlined_call_operand.hbm [shape: f32[4,3,8,8], index: 3, kind: output, shape index: {}]  }
   0x1   :  { %9 = vsyncpa [#allocation3], 0 }
   0x2   :  { %10 = vsyncpa [#allocation8], 0 }
   0x3   :  { %12 = vsyncpa [#allocation8 + $0x1], 0 }
   0x4   :  { %13 = vsyncpa [#allocation4], 0 }
   0x5   :  { %15 = vsyncpa [#allocation4 + $0x1], 0  ;;  %s1301_s12 = smov 0   ;;  %s1303_s13 = smov 0  }
   0x6   :  { %s1305_s14 = smov 0   ;;  %s1307_s15 = smov 0  }
   0x7 LB: > { %s1322_s16 = sadd.s32 4294967295, %s1271_s15   ;;  %s1038_s17 = sadd.s32 4294967294, %s1271_s15   ;;  %s1271_s15 = sphi %s1307_s15, %s1817_s15   ;;  %s1267_s14 = sphi %s1305_s14, %s1816_s14   ;;  %s1263_s13 = sphi %s1303_s13, %s1815_s13   ;;  %s1259_s12 = sphi %s1301_s12, %s1814_s12  }
   0x8   : > { %s1326_s18 = sadd.s32 1, %s1271_s15   ;;  %s70_s19 = sadd.s32 1, %s1267_s14 }
   0x9   : > { %s67_s20 = ssub.s32 %s1271_s15, %s1326_s18  ;;  %p77_p0 = scmp.ne.s32.totalorder %s1267_s14, %s1263_s13 }
   0xa   : > { %p68_p1 = scmp.eq.s32.totalorder %s67_s20, 0  ;;  %p78_p2 = scmp.eq.s32.totalorder %s1271_s15, 0 }
   0xb   : > { %p83_p3 = scmp.ne.s32.totalorder %s1263_s13, %s1259_s12  ;;  %p1795_p4 = scmp.eq.s32.totalorder %s1322_s16, 0 }
   0xc   : > { %s1338_s21 = scalar_select %p68_p1, %s1267_s14, %s70_s19  }
   0xd   : > { %p79_p5 = por %p78_p2, %p77_p0  ;;  %p1342_p6 = por %p1795_p4, %p83_p3 }
   0xe   : > { %p107_p7 = scmp.eq.s32.totalorder %s1322_s16, 3  ;;  %p113_p8 = scmp.eq.s32.totalorder %s1038_s17, 3 }
   0xf   : > { %s1799_s22 = scalar_select %p1342_p6, 1, 0 }
  0x10   : > { %p1039_p9 = scmp.ge.s32.totalorder %s1271_s15, 1  ;;  %p120_p10 = scmp.lt.s32.totalorder %s1271_s15, 5 }
  0x11   : > { %p1349_p11 = por %p107_p7, %p77_p0  ;;  %p1353_p12 = por %p113_p8, %p83_p3 }
  0x12   : > { %p1357_p13 = pnand %p1039_p9, %p120_p10  ;;  %p1083_p2 = scmp.lt.s32.totalorder %s1271_s15, 4 }
  0x13   : > { %s1800_s23 = scalar_select %p1349_p11, 1, 0 }
  0x14   : > { %s1801_s24 = scalar_select %p1353_p12, 1, 0 }
  0x15   : > { %s1802_s25 = scalar_select %p1357_p13, 1, 0 }
  0x16   : > { %p1066_p1 = pneg %p1357_p13  ;;  %p1370_p0 = pnand %p1083_p2, %p79_p5 }
  0x17   : > { %s1273_s28 = smov [#allocation6]   ;;  %s1126_s5 = scalar_lea.hbm %s1790_s0, 16 }
  0x18   : > { %p1366_p6 = pnand %p1066_p1, %p1795_p4  ;;  %s141_s29 = sshll.u32 %s1273_s28, 4  ;;  %s142_s29 = int_to_ptr.vmem [resolvable:$true] %s141_s29 }
  0x19   : > { %s1804_s27 = scalar_select %p1370_p0, 1, 0 }
  0x1a   : > { %p1127_p3 = scmp.ne.s32.totalorder %s1790_s0, %s1126_s5  ;;  %p1128_p7 = pneg %p1366_p6 }
  0x1b   : > { %p1133_p5 = scmp.lt.u32.totalorder %s1126_s5, %s1790_s0 }
  0x1c   : > { %p1129_p8 = pnand %p1128_p7, %p1127_p3 }
  0x1e   : > { %p1130_p9 = pneg %p1129_p8 }
  0x20   : > { %p1135_p10 = pnand %p1133_p5, %p1130_p9 }
  0x22   : > { %1138 = shalt.err (!%p1135_p10)
}
  0x23   : > { %s1274_s10 = smov [#allocation2]   ;;  %s155_s19 = sand.u32 1, %s1267_s14  }
  0x24   : > { %1069 = dma.hbm_to_smem (!%p1366_p6), %s1790_s0, 16, %s1274_s10, [#allocation5]  }
  0x25   : > { %s1139_s30 = scalar_lea.hbm %s1791_s1, 3072 }
  0x26   : > { %p1140_p1 = scmp.ne.s32.totalorder %s1791_s1, %s1139_s30  ;;  %p1146_p8 = scmp.lt.u32.totalorder %s1139_s30, %s1791_s1 }
  0x28   : > { %p1142_p2 = pnand %p1140_p1, %p1128_p7 }
  0x2a   : > { %p1143_p3 = pneg %p1142_p2 }
  0x2c   : > { %p1148_p9 = pnand %p1146_p8, %p1143_p3 }
  0x2e   : > { %1151 = shalt.err (!%p1148_p9)
}
  0x2f   : > { %s1152_s8 = scalar_lea.vmem %s142_s29, 3072  ;;  %p1160_p12 = scmp.lt.s32.totalorder %s142_s29, %s142_s29 }
  0x30   : > { %p1153_p5 = scmp.ne.s32.totalorder %s142_s29, %s1152_s8  ;;  %p1161_p11 = scmp.lt.s32.totalorder %s1152_s8, %s1152_s8 }
  0x32   : > { %p1155_p10 = pnand %p1153_p5, %p1128_p7  ;;  %p1162_p13 = por %p1161_p11, %p1160_p12 }
  0x34   : > { %p1156_p4 = pneg %p1155_p10 }
  0x36   : > { %p1163_p0 = pnand %p1162_p13, %p1156_p4 }
  0x38   : > { %1166 = shalt.err (!%p1163_p0)
}
  0x39   : > { %s1275_s9 = smov 128   ;;  %s1276_s10 = smov 8  }
  0x3a   : > { %1072 = dma.hbm_to_vmem [thread:$0]  (!%p1366_p6), %s1791_s1, 3072, %s142_s29, [#allocation3], %s1275_s9, %s1275_s9, %s1276_s10  }
  0x3b   : > { %s1050_s20 = smul.u32 24, %s155_s19  ;;  %s1425_s7 = scalar_lea.sflag [#allocation8], %s155_s19 }
  0x3c   : > { %s1051_s28 = smul.u32 384, %s1271_s15  ;;  %p1805_p6 = scmp.ne.s32.totalorder %s1804_s27, 0 }
  0x3d   : > { %s159_s5 = scalar_lea.vmem [#allocation7], %s1050_s20  ;;  %s1172_s17 = scalar_lea.hbm %s1792_s2, 1536 }
  0x3e   : > { %s1421_s6 = scalar_lea.hbm %s1792_s2, %s1051_s28  ;;  %s166_s26 = sshll.u32 %s159_s5, 4  ;;  %s1423_s26 = int_to_ptr.vmem [resolvable:$true] %s166_s26 }
  0x3f   : > { %s1167_s8 = scalar_lea.hbm %s1421_s6, 384  ;;  %p1169_p11 = pneg %p1805_p6 }
  0x40   : > { %p1168_p4 = scmp.ne.s32.totalorder %s1421_s6, %s1167_s8  ;;  %p1173_p0 = scmp.lt.u32.totalorder %s1421_s6, %s1792_s2 }
  0x41   : > { %p1174_p7 = scmp.lt.u32.totalorder %s1172_s17, %s1167_s8  ;;  %p1176_p2 = scmp.lt.u32.totalorder %s1167_s8, %s1421_s6 }
  0x42   : > { %p1170_p12 = pnand %p1169_p11, %p1168_p4 }
  0x43   : > { %p1175_p1 = por %p1174_p7, %p1173_p0 }
  0x44   : > { %p1171_p13 = pneg %p1170_p12 }
  0x45   : > { %p1177_p3 = por %p1176_p2, %p1175_p1 }
  0x47   : > { %p1178_p8 = pnand %p1177_p3, %p1171_p13 }
  0x49   : > { %1181 = shalt.err (!%p1178_p8)
}
  0x4a   : > { %s1182_s19 = scalar_lea.vmem %s1423_s26, 384  ;;  %s1277_s20 = smov [#allocation7]  }
  0x4b   : > { %p1183_p9 = scmp.ne.s32.totalorder %s1423_s26, %s1182_s19  ;;  %s1187_s4 = sshll.u32 %s1277_s20, 4  ;;  %s1188_s4 = int_to_ptr.vmem [resolvable:$false] %s1187_s4 }
  0x4c   : > { %s1189_s5 = scalar_lea.vmem %s1188_s4, 768  ;;  %p1190_p4 = scmp.lt.s32.totalorder %s1423_s26, %s1188_s4 }
  0x4d   : > { %p1185_p5 = pnand %p1183_p9, %p1169_p11  ;;  %p1191_p12 = scmp.lt.s32.totalorder %s1189_s5, %s1182_s19 }
  0x4f   : > { %p1186_p10 = pneg %p1185_p5  ;;  %p1192_p0 = por %p1191_p12, %p1190_p4 }
  0x51   : > { %p1193_p7 = pnand %p1192_p0, %p1186_p10 }
  0x53   : > { %1196 = shalt.err (!%p1193_p7)
}
  0x54   : > { %1076 = dma.hbm_to_vmem [thread:$0]  (!%p1805_p6), %s1421_s6, 384, %s1423_s26, %s1425_s7, %s1275_s9, %s1275_s9, %s1276_s10  }
  0x55   : > { %p1806_p11 = scmp.ne.s32.totalorder %s1802_s25, 0 }
  0x56   : > { %p1807_p13 = scmp.eq.s32.totalorder (!%p1806_p11), %s1322_s16, 0 }
  0x57   : > { %178 = sbr.rel (%p1806_p11) target bundleno = 546 (0x222), region = 32 }
  0x5e   : > { %1242 = dma.done.wait (%p1807_p13), [#allocation5], 16   ;;  %p1808_p1 = pmov %p1807_p13 }
  0x60   : > { %1244 = vsyncadd (%p1808_p1), [#allocation5], 4294967280  ;;  %p1809_p2 = pmov %p1808_p1 }
  0x61   : > { %p1810_p3 = pmov %p1808_p1 }
  0x62   : > { %1246 = dma.done.wait (%p1809_p2), [#allocation3], 3072  }
  0x63   : > { %1248 = vsyncadd (%p1810_p3), [#allocation3], 4294964224  ;;  %s1467_s27 = sand.u32 1, %s1263_s13   ;;  %p1811_p6 = scmp.ne.s32.totalorder %s1799_s22, 0 }
  0x64   : > { %s1052_s25 = smul.u32 24, %s1467_s27  ;;  %s189_s9 = scalar_lea.sflag [#allocation8], %s1467_s27 }
  0x66   : > { %s1473_s10 = scalar_lea.vmem [#allocation7], %s1052_s25 }
  0x67   : > { %1250 = dma.done.wait (%p1811_p6), %s189_s9, 384  }
  0x68   : > { %1252 = vsyncadd (%p1811_p6), %s189_s9, 4294966912 }
  0x69   : > { %197 = sfence }
  0x6a   : > { %v1479_v0 = vld [vmem:[#allocation6] sm:$0xff]  ;;  %v1481_v1 = vld [vmem:[#allocation6 + $0x8] sm:$0xff]  ;;  %v1483_v2 = vld [vmem:[#allocation6 + $0x10] sm:$0xff]  ;;  %vm552_vm0 = vcmask 1041409   ;;  %vm554_vm1 = vcmask 1042434   ;;  %vm556_vm2 = vcmask 1043459  }
  0x6b   : > { %v1485_v3 = vld [vmem:[#allocation6 + $0x18] sm:$0xff]  ;;  %v1487_v4 = vld [vmem:[#allocation6 + $0x20] sm:$0xff]  ;;  %v1489_v5 = vld [vmem:[#allocation6 + $0x28] sm:$0xff]  ;;  %v240_v6 = vrot.slane %v1479_v0, 4  ;;  %v246_v7 = vrot.slane %v1481_v1, 4  ;;  %v252_v8 = vrot.slane %v1483_v2, 4 }
  0x6c   : > { %v1494_v9 = vld [vmem:[#allocation6 + $0x30] sm:$0xff]  ;;  %v1496_v10 = vld [vmem:[#allocation6 + $0x38] sm:$0xff]  ;;  %v258_v11 = vrot.slane %v1485_v3, 4  ;;  %v264_v12 = vrot.slane %v1487_v4, 4  ;;  %v270_v13 = vrot.slane %v1489_v5, 4  ;;  %vm558_vm3 = vcmask 1044484  }
  0x6d   : > { %v276_v14 = vrot.slane %v1494_v9, 4  ;;  %v282_v15 = vrot.slane %v1496_v10, 4  ;;  %v385_v16 = vmax.f32 %v1479_v0, %v240_v6  ;;  %v391_v17 = vmax.f32 %v1481_v1, %v246_v7  ;;  %s912_s22 = sld [smem:[#allocation2 + %s1322_s16]]  ;;  %s215_s6 = scalar_lea.vmem [#allocation9], %s1052_s25 }
  0x6e   : > { %v397_v18 = vmax.f32 %v1483_v2, %v252_v8  ;;  %v403_v19 = vmax.f32 %v1485_v3, %v258_v11  ;;  %v409_v20 = vmax.f32 %v1487_v4, %v264_v12  ;;  %v415_v21 = vmax.f32 %v1489_v5, %v270_v13  ;;  %s941_s26 = sshll.u32 %s215_s6, 4  ;;  %s1053_s7 = smul.u32 384, %s1322_s16  ;;  %s1740_s26 = int_to_ptr.vmem [resolvable:$true] %s941_s26 }
  0x6f   : > { %v386_v22 = vrot.slane %v385_v16, 2  ;;  %v392_v23 = vrot.slane %v391_v17, 2  ;;  %v421_v24 = vmax.f32 %v1494_v9, %v276_v14  ;;  %v427_v25 = vmax.f32 %v1496_v10, %v282_v15  ;;  %s928_s17 = scalar_lea.sflag [#allocation4], %s1467_s27  ;;  %s1197_s28 = scalar_lea.vmem %s1740_s26, 384 }
  0x70   : > { %v398_v26 = vrot.slane %v397_v18, 2  ;;  %v404_v27 = vrot.slane %v403_v19, 2  ;;  %v410_v28 = vrot.slane %v409_v20, 2  ;;  %v416_v29 = vrot.slane %v415_v21, 2  ;;  %s1746_s11 = scalar_lea.hbm %s1793_s3, %s1053_s7  ;;  %p1198_p8 = scmp.ne.s32.totalorder %s1740_s26, %s1197_s28 }
  0x71   : > { %v387_v30 = vmax.f32 %v385_v16, %v386_v22  ;;  %v393_v31 = vmax.f32 %v391_v17, %v392_v23  ;;  %v422_v32 = vrot.slane %v421_v24, 2  ;;  %v428_v33 = vrot.slane %v427_v25, 2  ;;  %p1812_p9 = scmp.ne.s32.totalorder %s1800_s23, 0  ;;  %s1278_s16 = smov [#allocation9]  }
  0x72   : > { %v399_v34 = vmax.f32 %v397_v18, %v398_v26  ;;  %v405_v35 = vmax.f32 %v403_v19, %v404_v27  ;;  %v411_v36 = vmax.f32 %v409_v20, %v410_v28  ;;  %v417_v37 = vmax.f32 %v415_v21, %v416_v29  ;;  %v1531_v27 = vld [vmem:[#allocation6 + $0x40] sm:$0xff]  ;;  %s1201_s30 = sshll.u32 %s1278_s16, 4  ;;  %s1202_s30 = int_to_ptr.vmem [resolvable:$false] %s1201_s30 }
  0x73   : > { %v388_v38 = vrot.slane %v387_v30, 1  ;;  %v394_v39 = vrot.slane %v393_v31, 1  ;;  %v423_v40 = vmax.f32 %v421_v24, %v422_v32  ;;  %v429_v41 = vmax.f32 %v427_v25, %v428_v33  ;;  %v1536_v32 = vld [vmem:[#allocation6 + $0x48] sm:$0xff]  ;;  %v1538_v33 = vld [vmem:[#allocation6 + $0x50] sm:$0xff]  ;;  %p1199_p5 = pnand %p1198_p8, %p1812_p9  ;;  %s1203_s19 = scalar_lea.vmem %s1202_s30, 768 }
  0x74   : > { %v400_v42 = vrot.slane %v399_v34, 1  ;;  %v406_v43 = vrot.slane %v405_v35, 1  ;;  %v412_v44 = vrot.slane %v411_v36, 1  ;;  %v418_v45 = vrot.slane %v417_v37, 1  ;;  %p1204_p4 = scmp.lt.s32.totalorder %s1740_s26, %s1202_s30  ;;  %p1205_p12 = scmp.lt.s32.totalorder %s1203_s19, %s1197_s28 }
  0x75   : > { %v389_v46 = vmax.f32 %v387_v30, %v388_v38  ;;  %v395_v47 = vmax.f32 %v393_v31, %v394_v39  ;;  %v424_v48 = vrot.slane %v423_v40, 1  ;;  %v430_v49 = vrot.slane %v429_v41, 1  ;;  %v1540_v38 = vld [vmem:[#allocation6 + $0x58] sm:$0xff]  ;;  %p1200_p10 = pneg %p1199_p5 }
  0x76   : > { %v401_v50 = vmax.f32 %v399_v34, %v400_v42  ;;  %v407_v51 = vmax.f32 %v405_v35, %v406_v43  ;;  %v413_v52 = vmax.f32 %v411_v36, %v412_v44  ;;  %v419_v53 = vmax.f32 %v417_v37, %v418_v45  ;;  %v1547_v42 = vld [vmem:[#allocation6 + $0x70] sm:$0xff]  ;;  %v1551_v44 = vld [vmem:[#allocation6 + $0x78] sm:$0xff]  ;;  %p1206_p0 = por %p1205_p12, %p1204_p4 }
  0x77   : > { %v425_v54 = vmax.f32 %v423_v40, %v424_v48  ;;  %v431_v55 = vmax.f32 %v429_v41, %v430_v49  ;;  %vm560_vm4 = vcmask 1045509   ;;  %vm562_vm5 = vcmask 1046534   ;;  %v1545_v41 = vld [vmem:[#allocation6 + $0x68] sm:$0xff] }
  0x78   : > { %vm564_vm6 = vcmask 1047559   ;;  %v639_v56 = vsel %vm552_vm0, %v395_v47, %v389_v46  ;;  %v241_v57 = vadd.f32 %v240_v6, %v1479_v0  ;;  %v247_v58 = vadd.f32 %v246_v7, %v1481_v1  ;;  %p1207_p7 = pnand %p1206_p0, %p1200_p10 }
  0x79   : > { %v640_v59 = vsel %vm554_vm1, %v401_v50, %v639_v56  ;;  %v253_v60 = vadd.f32 %v252_v8, %v1483_v2  ;;  %v259_v61 = vadd.f32 %v258_v11, %v1485_v3  ;;  %v265_v62 = vadd.f32 %v264_v12, %v1487_v4 }
  0x7a   : > { %v641_v63 = vsel %vm556_vm2, %v407_v51, %v640_v59  ;;  %v242_v16 = vrot.slane %v241_v57, 2  ;;  %v248_v17 = vrot.slane %v247_v58, 2  ;;  %v271_v18 = vadd.f32 %v270_v13, %v1489_v5 }
  0x7b   : > { %v642_v19 = vsel %vm558_vm3, %v413_v52, %v641_v63  ;;  %v254_v20 = vrot.slane %v253_v60, 2  ;;  %v260_v0 = vrot.slane %v259_v61, 2  ;;  %v266_v6 = vrot.slane %v265_v62, 2 }
  0x7c   : > { %v643_v1 = vsel %vm560_vm4, %v419_v53, %v642_v19  ;;  %v243_v7 = vadd.f32 %v242_v16, %v241_v57  ;;  %v249_v21 = vadd.f32 %v248_v17, %v247_v58  ;;  %v272_v2 = vrot.slane %v271_v18, 2 }
  0x7d   : > { %v644_v3 = vsel %vm562_vm5, %v425_v54, %v643_v1  ;;  %v255_v8 = vadd.f32 %v254_v20, %v253_v60  ;;  %v261_v4 = vadd.f32 %v260_v0, %v259_v61  ;;  %v267_v11 = vadd.f32 %v266_v6, %v265_v62 }
  0x7e   : > { %v645_v12 = vsel %vm564_vm6, %v431_v55, %v644_v3  ;;  %v244_v22 = vrot.slane %v243_v7, 1  ;;  %v250_v23 = vrot.slane %v249_v21, 1  ;;  %v273_v5 = vadd.f32 %v272_v2, %v271_v18 }
  0x7f   : > { %663 = vxpose.xlu1.b32.start [1/3] (short) %v645_v12, 128  ;;  %v256_v13 = vrot.slane %v255_v8, 1  ;;  %v262_v24 = vrot.slane %v261_v4, 1  ;;  %v268_v25 = vrot.slane %v267_v11, 1  ;;  %v277_v26 = vadd.f32 %v276_v14, %v1494_v9  ;;  %v1542_v9 = vld [vmem:[#allocation6 + $0x60] sm:$0xff] }
  0x80   : > { %v245_v28 = vadd.f32 %v244_v22, %v243_v7  ;;  %v251_v29 = vadd.f32 %v250_v23, %v249_v21  ;;  %v274_v30 = vrot.slane %v273_v5, 1  ;;  %v283_v31 = vadd.f32 %v282_v15, %v1496_v10 }
  0x81   : > { %v257_v34 = vadd.f32 %v256_v13, %v255_v8  ;;  %v263_v35 = vadd.f32 %v262_v24, %v261_v4  ;;  %v269_v36 = vadd.f32 %v268_v25, %v267_v11  ;;  %v278_v37 = vrot.slane %v277_v26, 2 }
  0x82   : > { %v275_v14 = vadd.f32 %v274_v30, %v273_v5  ;;  %v284_v39 = vrot.slane %v283_v31, 2  ;;  %v553_v40 = vsel %vm552_vm0, %v251_v29, %v245_v28  ;;  %v288_v10 = vrot.slane %v1531_v27, 4 }
  0x83   : > { %v279_v15 = vadd.f32 %v278_v37, %v277_v26  ;;  %v555_v43 = vsel %vm554_vm1, %v257_v34, %v553_v40  ;;  %v294_v45 = vrot.slane %v1536_v32, 4  ;;  %v300_v46 = vrot.slane %v1538_v33, 4 }
  0x84   : > { %v285_v47 = vadd.f32 %v284_v39, %v283_v31  ;;  %v557_v48 = vsel %vm556_vm2, %v263_v35, %v555_v43  ;;  %v306_v49 = vrot.slane %v1540_v38, 4  ;;  %v312_v50 = vrot.slane %v1542_v9, 4 }
  0x85   : > { %v280_v51 = vrot.slane %v279_v15, 1  ;;  %v559_v52 = vsel %vm558_vm3, %v269_v36, %v557_v48  ;;  %v318_v53 = vrot.slane %v1545_v41, 4  ;;  %v324_v54 = vrot.slane %v1547_v42, 4 }
  0x86   : > { %v286_v55 = vrot.slane %v285_v47, 1  ;;  %v561_v56 = vsel %vm560_vm4, %v275_v14, %v559_v52  ;;  %v330_v57 = vrot.slane %v1551_v44, 4  ;;  %v433_v58 = vmax.f32 %v1531_v27, %v288_v10 }
  0x87   : > { %v281_v59 = vadd.f32 %v280_v51, %v279_v15  ;;  %v439_v60 = vmax.f32 %v1536_v32, %v294_v45  ;;  %v445_v61 = vmax.f32 %v1538_v33, %v300_v46  ;;  %v451_v62 = vmax.f32 %v1540_v38, %v306_v49 }
  0x88   : > { %v287_v63 = vadd.f32 %v286_v55, %v285_v47  ;;  %v434_v16 = vrot.slane %v433_v58, 2  ;;  %v457_v17 = vmax.f32 %v1542_v9, %v312_v50  ;;  %v463_v18 = vmax.f32 %v1545_v41, %v318_v53 }
  0x89   : > { %v563_v19 = vsel %vm562_vm5, %v281_v59, %v561_v56  ;;  %v440_v20 = vrot.slane %v439_v60, 2  ;;  %v446_v0 = vrot.slane %v445_v61, 2  ;;  %v452_v6 = vrot.slane %v451_v62, 2 }
  0x8a   : > { %v565_v1 = vsel %vm564_vm6, %v287_v63, %v563_v19  ;;  %v435_v7 = vmax.f32 %v433_v58, %v434_v16  ;;  %v458_v21 = vrot.slane %v457_v17, 2  ;;  %v464_v2 = vrot.slane %v463_v18, 2 }
  0x8b   : > { %583 = vxpose.xlu0.b32.start [1/3] (short) %v565_v1, 128  ;;  %v441_v3 = vmax.f32 %v439_v60, %v440_v20  ;;  %v447_v8 = vmax.f32 %v445_v61, %v446_v0  ;;  %v453_v4 = vmax.f32 %v451_v62, %v452_v6  ;;  %v469_v11 = vmax.f32 %v1547_v42, %v324_v54  ;;  %v1598_v1 = vld [vmem:[#allocation6 + $0x80] sm:$0xff] }
  0x8c   : > { %v436_v12 = vrot.slane %v435_v7, 1  ;;  %v459_v22 = vmax.f32 %v457_v17, %v458_v21  ;;  %v465_v23 = vmax.f32 %v463_v18, %v464_v2  ;;  %v475_v5 = vmax.f32 %v1551_v44, %v330_v57 }
  0x8d   : > { %v442_v13 = vrot.slane %v441_v3, 1  ;;  %v448_v24 = vrot.slane %v447_v8, 1  ;;  %v454_v25 = vrot.slane %v453_v4, 1  ;;  %v470_v26 = vrot.slane %v469_v11, 2 }
  0x8e   : > { %v437_v28 = vmax.f32 %v435_v7, %v436_v12  ;;  %v460_v29 = vrot.slane %v459_v22, 1  ;;  %v466_v30 = vrot.slane %v465_v23, 1  ;;  %v476_v31 = vrot.slane %v475_v5, 2 }
  0x8f   : > { %v443_v34 = vmax.f32 %v441_v3, %v442_v13  ;;  %v449_v35 = vmax.f32 %v447_v8, %v448_v24  ;;  %v455_v36 = vmax.f32 %v453_v4, %v454_v25  ;;  %v471_v37 = vmax.f32 %v469_v11, %v470_v26  ;;  %v1608_v4 = vld [vmem:[#allocation6 + $0x90] sm:$0xff]  ;;  %v1614_v24 = vld [vmem:[#allocation6 + $0xa0] sm:$0xff]  ;;  %v1616_v25 = vld [vmem:[#allocation6 + $0xa8] sm:$0xff] }
  0x90   : > { %v461_v14 = vmax.f32 %v459_v22, %v460_v29  ;;  %v467_v39 = vmax.f32 %v465_v23, %v466_v30  ;;  %v477_v40 = vmax.f32 %v475_v5, %v476_v31  ;;  %v289_v15 = vadd.f32 %v288_v10, %v1531_v27  ;;  %v1610_v23 = vld [vmem:[#allocation6 + $0x98] sm:$0xff]  ;;  %v1620_v29 = vld [vmem:[#allocation6 + $0xb0] sm:$0xff] }
  0x91   : > { %v472_v43 = vrot.slane %v471_v37, 1  ;;  %v646_v47 = vsel %vm552_vm0, %v443_v34, %v437_v28  ;;  %v295_v48 = vadd.f32 %v294_v45, %v1536_v32  ;;  %v301_v51 = vadd.f32 %v300_v46, %v1538_v33  ;;  %v1622_v30 = vld [vmem:[#allocation6 + $0xb8] sm:$0xff] }
  0x92   : > { %v478_v52 = vrot.slane %v477_v40, 1  ;;  %v647_v55 = vsel %vm554_vm1, %v449_v35, %v646_v47  ;;  %v290_v56 = vrot.slane %v289_v15, 2  ;;  %v307_v58 = vadd.f32 %v306_v49, %v1540_v38 }
  0x93   : > { %v473_v59 = vmax.f32 %v471_v37, %v472_v43  ;;  %v648_v60 = vsel %vm556_vm2, %v455_v36, %v647_v55  ;;  %v296_v61 = vrot.slane %v295_v48, 2  ;;  %v302_v62 = vrot.slane %v301_v51, 2 }
  0x94   : > { %v479_v63 = vmax.f32 %v477_v40, %v478_v52  ;;  %v649_v27 = vsel %vm558_vm3, %v461_v14, %v648_v60  ;;  %v291_v10 = vadd.f32 %v290_v56, %v289_v15  ;;  %v308_v16 = vrot.slane %v307_v58, 2 }
  0x95   : > { %v650_v32 = vsel %vm560_vm4, %v467_v39, %v649_v27  ;;  %v297_v45 = vadd.f32 %v296_v61, %v295_v48  ;;  %v303_v33 = vadd.f32 %v302_v62, %v301_v51  ;;  %v313_v46 = vadd.f32 %v312_v50, %v1542_v9  ;;  %v1603_v50 = vld [vmem:[#allocation6 + $0x88] sm:$0xff] }
  0x96   : > { %v651_v38 = vsel %vm562_vm5, %v473_v59, %v650_v32  ;;  %v292_v49 = vrot.slane %v291_v10, 1  ;;  %v309_v17 = vadd.f32 %v308_v16, %v307_v58  ;;  %v319_v18 = vadd.f32 %v318_v53, %v1545_v41 }
  0x97   : > { %v652_v19 = vsel %vm564_vm6, %v479_v63, %v651_v38  ;;  %v298_v20 = vrot.slane %v297_v45, 1  ;;  %v304_v0 = vrot.slane %v303_v33, 1  ;;  %v314_v6 = vrot.slane %v313_v46, 2 }
  0x98   : > { %664 = vxpose.xlu1.b32.cont [2/3] (short) %v652_v19, 128  ;;  %v293_v7 = vadd.f32 %v292_v49, %v291_v10  ;;  %v310_v21 = vrot.slane %v309_v17, 1  ;;  %v320_v2 = vrot.slane %v319_v18, 2  ;;  %v325_v9 = vadd.f32 %v324_v54, %v1547_v42 }
  0x99   : > { %v299_v3 = vadd.f32 %v298_v20, %v297_v45  ;;  %v305_v8 = vadd.f32 %v304_v0, %v303_v33  ;;  %v315_v41 = vadd.f32 %v314_v6, %v313_v46  ;;  %v331_v53 = vadd.f32 %v330_v57, %v1551_v44 }
  0x9a   : > { %v311_v11 = vadd.f32 %v310_v21, %v309_v17  ;;  %v321_v12 = vadd.f32 %v320_v2, %v319_v18  ;;  %v326_v22 = vrot.slane %v325_v9, 2  ;;  %v336_v5 = vrot.slane %v1598_v1, 4 }
  0x9b   : > { %v316_v13 = vrot.slane %v315_v41, 1  ;;  %v332_v42 = vrot.slane %v331_v53, 2  ;;  %v566_v54 = vsel %vm552_vm0, %v299_v3, %v293_v7  ;;  %v342_v26 = vrot.slane %v1603_v50, 4 }
  0x9c   : > { %v322_v44 = vrot.slane %v321_v12, 1  ;;  %v327_v57 = vadd.f32 %v326_v22, %v325_v9  ;;  %v567_v28 = vsel %vm554_vm1, %v305_v8, %v566_v54  ;;  %v348_v31 = vrot.slane %v1608_v4, 4 }
  0x9d   : > { %v317_v34 = vadd.f32 %v316_v13, %v315_v41  ;;  %v333_v35 = vadd.f32 %v332_v42, %v331_v53  ;;  %v568_v36 = vsel %vm556_vm2, %v311_v11, %v567_v28  ;;  %v354_v37 = vrot.slane %v1610_v23, 4 }
  0x9e   : > { %v323_v14 = vadd.f32 %v322_v44, %v321_v12  ;;  %v328_v39 = vrot.slane %v327_v57, 1  ;;  %v360_v40 = vrot.slane %v1614_v24, 4  ;;  %v366_v15 = vrot.slane %v1616_v25, 4 }
  0x9f   : > { %v334_v43 = vrot.slane %v333_v35, 1  ;;  %v569_v47 = vsel %vm558_vm3, %v317_v34, %v568_v36  ;;  %v372_v48 = vrot.slane %v1620_v29, 4  ;;  %v378_v51 = vrot.slane %v1622_v30, 4 }
  0xa0   : > { %v329_v52 = vadd.f32 %v328_v39, %v327_v57  ;;  %v570_v55 = vsel %vm560_vm4, %v323_v14, %v569_v47  ;;  %v481_v56 = vmax.f32 %v1598_v1, %v336_v5  ;;  %v487_v58 = vmax.f32 %v1603_v50, %v342_v26 }
  0xa1   : > { %v335_v59 = vadd.f32 %v334_v43, %v333_v35  ;;  %v493_v60 = vmax.f32 %v1608_v4, %v348_v31  ;;  %v499_v61 = vmax.f32 %v1610_v23, %v354_v37  ;;  %v505_v62 = vmax.f32 %v1614_v24, %v360_v40 }
  0xa2   : > { %v571_v63 = vsel %vm562_vm5, %v329_v52, %v570_v55  ;;  %v482_v27 = vrot.slane %v481_v56, 2  ;;  %v488_v10 = vrot.slane %v487_v58, 2  ;;  %v511_v16 = vmax.f32 %v1616_v25, %v366_v15 }
  0xa3   : > { %v572_v32 = vsel %vm564_vm6, %v335_v59, %v571_v63  ;;  %v494_v45 = vrot.slane %v493_v60, 2  ;;  %v500_v33 = vrot.slane %v499_v61, 2  ;;  %v506_v46 = vrot.slane %v505_v62, 2 }
  0xa4   : > { %584 = vxpose.xlu0.b32.cont [2/3] (short) %v572_v32, 128  ;;  %v483_v38 = vmax.f32 %v481_v56, %v482_v27  ;;  %v489_v49 = vmax.f32 %v487_v58, %v488_v10  ;;  %v512_v17 = vrot.slane %v511_v16, 2  ;;  %v517_v18 = vmax.f32 %v1620_v29, %v372_v48 }
  0xa5   : > { %v495_v19 = vmax.f32 %v493_v60, %v494_v45  ;;  %v501_v20 = vmax.f32 %v499_v61, %v500_v33  ;;  %v507_v0 = vmax.f32 %v505_v62, %v506_v46  ;;  %v523_v6 = vmax.f32 %v1622_v30, %v378_v51 }
  0xa6   : > { %v484_v7 = vrot.slane %v483_v38, 1  ;;  %v490_v21 = vrot.slane %v489_v49, 1  ;;  %v513_v2 = vmax.f32 %v511_v16, %v512_v17  ;;  %v518_v9 = vrot.slane %v517_v18, 2 }
  0xa7   : > { %v496_v3 = vrot.slane %v495_v19, 1  ;;  %v502_v8 = vrot.slane %v501_v20, 1  ;;  %v508_v41 = vrot.slane %v507_v0, 1  ;;  %v524_v53 = vrot.slane %v523_v6, 2 }
  0xa8   : > { %v485_v11 = vmax.f32 %v483_v38, %v484_v7  ;;  %v491_v12 = vmax.f32 %v489_v49, %v490_v21  ;;  %v514_v22 = vrot.slane %v513_v2, 1  ;;  %v519_v13 = vmax.f32 %v517_v18, %v518_v9 }
  0xa9   : > { %v497_v42 = vmax.f32 %v495_v19, %v496_v3  ;;  %v503_v54 = vmax.f32 %v501_v20, %v502_v8  ;;  %v509_v44 = vmax.f32 %v507_v0, %v508_v41  ;;  %v525_v57 = vmax.f32 %v523_v6, %v524_v53 }
  0xaa   : > { %v515_v28 = vmax.f32 %v513_v2, %v514_v22  ;;  %v520_v34 = vrot.slane %v519_v13, 1  ;;  %v653_v35 = vsel %vm552_vm0, %v491_v12, %v485_v11  ;;  %v337_v36 = vadd.f32 %v336_v5, %v1598_v1 }
  0xab   : > { %v526_v14 = vrot.slane %v525_v57, 1  ;;  %v654_v39 = vsel %vm554_vm1, %v497_v42, %v653_v35  ;;  %v343_v43 = vadd.f32 %v342_v26, %v1603_v50  ;;  %v349_v47 = vadd.f32 %v348_v31, %v1608_v4 }
  0xac   : > { %v521_v52 = vmax.f32 %v519_v13, %v520_v34  ;;  %v655_v55 = vsel %vm556_vm2, %v503_v54, %v654_v39  ;;  %v338_v56 = vrot.slane %v337_v36, 2  ;;  %v355_v58 = vadd.f32 %v354_v37, %v1610_v23 }
  0xad   : > { %v527_v59 = vmax.f32 %v525_v57, %v526_v14  ;;  %v656_v60 = vsel %vm558_vm3, %v509_v44, %v655_v55  ;;  %v344_v61 = vrot.slane %v343_v43, 2  ;;  %v350_v1 = vrot.slane %v349_v47, 2 }
  0xae   : > { %v657_v5 = vsel %vm560_vm4, %v515_v28, %v656_v60  ;;  %v339_v62 = vadd.f32 %v338_v56, %v337_v36  ;;  %v356_v63 = vrot.slane %v355_v58, 2  ;;  %v361_v50 = vadd.f32 %v360_v40, %v1614_v24 }
  0xaf   : > { %v658_v4 = vsel %vm562_vm5, %v521_v52, %v657_v5  ;;  %v345_v26 = vadd.f32 %v344_v61, %v343_v43  ;;  %v351_v31 = vadd.f32 %v350_v1, %v349_v47  ;;  %v367_v23 = vadd.f32 %v366_v15, %v1616_v25 }
  0xb0   : > { %v659_v37 = vsel %vm564_vm6, %v527_v59, %v658_v4  ;;  %v340_v27 = vrot.slane %v339_v62, 1  ;;  %v357_v10 = vadd.f32 %v356_v63, %v355_v58  ;;  %v362_v16 = vrot.slane %v361_v50, 2 }
  0xb1   : > { %665 = vxpose.xlu1.b32.end [3/3] (short) %v659_v37, 128  ;;  %v346_v32 = vrot.slane %v345_v26, 1  ;;  %v352_v45 = vrot.slane %v351_v31, 1  ;;  %v368_v33 = vrot.slane %v367_v23, 2  ;;  %v373_v24 = vadd.f32 %v372_v48, %v1620_v29 }
  0xb2   : > { %v341_v40 = vadd.f32 %v340_v27, %v339_v62  ;;  %v358_v46 = vrot.slane %v357_v10, 1  ;;  %v363_v38 = vadd.f32 %v362_v16, %v361_v50  ;;  %v379_v25 = vadd.f32 %v378_v51, %v1622_v30 }
  0xb3   : > { %v347_v15 = vadd.f32 %v346_v32, %v345_v26  ;;  %v353_v49 = vadd.f32 %v352_v45, %v351_v31  ;;  %v369_v17 = vadd.f32 %v368_v33, %v367_v23  ;;  %v374_v18 = vrot.slane %v373_v24, 2 }
  0xb4   : > { %v359_v19 = vadd.f32 %v358_v46, %v357_v10  ;;  %v364_v20 = vrot.slane %v363_v38, 1  ;;  %v380_v0 = vrot.slane %v379_v25, 2  ;;  %vm695_vm7 = vcmask 195584  }
  0xb5   : > { %v370_v6 = vrot.slane %v369_v17, 1  ;;  %v375_v7 = vadd.f32 %v374_v18, %v373_v24  ;;  %v573_v21 = vsel %vm552_vm0, %v347_v15, %v341_v40  ;;  %vm923_vm8 = vcmask 64512  }
  0xb6   : > { %v365_v2 = vadd.f32 %v364_v20, %v363_v38  ;;  %v381_v29 = vadd.f32 %v380_v0, %v379_v25  ;;  %v574_v48 = vsel %vm554_vm1, %v353_v49, %v573_v21 }
  0xb7   : > { %v371_v9 = vadd.f32 %v370_v6, %v369_v17  ;;  %v376_v3 = vrot.slane %v375_v7, 1  ;;  %v575_v8 = vsel %vm556_vm2, %v359_v19, %v574_v48 }
  0xb8   : > { %v382_v30 = vrot.slane %v381_v29, 1  ;;  %v576_v51 = vsel %vm558_vm3, %v365_v2, %v575_v8 }
  0xb9   : > { %v377_v41 = vadd.f32 %v376_v3, %v375_v7  ;;  %v577_v53 = vsel %vm560_vm4, %v371_v9, %v576_v51 }
  0xba   : > { %v383_v11 = vadd.f32 %v382_v30, %v381_v29 }
  0xbb   : > { %v578_v12 = vsel %vm562_vm5, %v377_v41, %v577_v53 }
  0xbc   : > { %v579_v22 = vsel %vm564_vm6, %v383_v11, %v578_v12 }
  0xbd   : > { %585 = vxpose.xlu0.b32.end [3/3] (short) %v579_v22, 128 }
 0x129   : > { %v679_v13 = vpop.trf.xlu1 }
 0x12a   : > { %v768_v58 = vsel %vm695_vm7, %v679_v13, -inf }
 0x12d   : > { %v680_v42 = vpop.trf.xlu1 }
 0x12e   : > { %v769_v56 = vsel %vm695_vm7, %v680_v42, -inf }
 0x12f   : > { %v770_v61 = vmax.f32 %v768_v58, %v769_v56 }
 0x131   : > { %v681_v54 = vpop.trf.xlu1  ;;  %v771_v50 = vrot.slane %v770_v61, 4 }
 0x132   : > { %v777_v37 = vsel %vm695_vm7, %v681_v54, -inf }
 0x133   : > { %v772_v32 = vmax.f32 %v770_v61, %v771_v50 }
 0x135   : > { %v599_v44 = vpop.trf.xlu0  ;;  %v682_v57 = vpop.trf.xlu1  ;;  %v773_v18 = vrot.slane %v772_v32, 2 }
 0x136   : > { %v696_v63 = vsel %vm695_vm7, %v599_v44, 0.0  ;;  %v778_v31 = vsel %vm695_vm7, %v682_v57, -inf }
 0x137   : > { %v779_v45 = vmax.f32 %v777_v37, %v778_v31  ;;  %v1706_v41 = vmax.f32 %v772_v32, %v773_v18 }
 0x139   : > { %v600_v28 = vpop.trf.xlu0  ;;  %v683_v34 = vpop.trf.xlu1  ;;  %v780_v19 = vrot.slane %v779_v45, 4 }
 0x13a   : > { %v697_v1 = vsel %vm695_vm7, %v600_v28, 0.0  ;;  %v786_v7 = vsel %vm695_vm7, %v683_v34, -inf }
 0x13b   : > { %v698_v26 = vadd.f32 %v697_v1, %v696_v63  ;;  %v781_v53 = vmax.f32 %v779_v45, %v780_v19 }
 0x13d   : > { %v601_v35 = vpop.trf.xlu0  ;;  %v684_v36 = vpop.trf.xlu1  ;;  %v699_v24 = vrot.slane %v698_v26, 4  ;;  %v782_v50 = vrot.slane %v781_v53, 2 }
 0x13e   : > { %v705_v23 = vsel %vm695_vm7, %v601_v35, 0.0  ;;  %v787_v25 = vsel %vm695_vm7, %v684_v36, -inf }
 0x13f   : > { %v700_v6 = vadd.f32 %v699_v24, %v698_v26  ;;  %v788_v29 = vmax.f32 %v786_v7, %v787_v25  ;;  %v783_v25 = vmax.f32 %v781_v53, %v782_v50 }
 0x141   : > { %v602_v14 = vpop.trf.xlu0  ;;  %v685_v39 = vpop.trf.xlu1  ;;  %v701_v11 = vrot.slane %v700_v6, 2  ;;  %v789_v42 = vrot.slane %v788_v29, 4 }
 0x142   : > { %v706_v4 = vsel %vm695_vm7, %v602_v14, 0.0  ;;  %v795_v12 = vsel %vm695_vm7, %v685_v39, -inf }
 0x143   : > { %v707_v27 = vadd.f32 %v706_v4, %v705_v23  ;;  %v790_v4 = vmax.f32 %v788_v29, %v789_v42 }
 0x145   : > { %v603_v43 = vpop.trf.xlu0  ;;  %v686_v47 = vpop.trf.xlu1  ;;  %v708_v38 = vrot.slane %v707_v27, 4 }
 0x146   : > { %v714_v40 = vsel %vm695_vm7, %v603_v43, 0.0  ;;  %v796_v8 = vsel %vm695_vm7, %v686_v47, -inf }
 0x147   : > { %v709_v9 = vadd.f32 %v708_v38, %v707_v27  ;;  %v797_v54 = vmax.f32 %v795_v12, %v796_v8 }
 0x149   : > { %v604_v52 = vpop.trf.xlu0  ;;  %v687_v55 = vpop.trf.xlu1  ;;  %v710_v28 = vrot.slane %v709_v9, 2  ;;  %v798_v1 = vrot.slane %v797_v54, 4 }
 0x14a   : > { %v715_v33 = vsel %vm695_vm7, %v604_v52, 0.0  ;;  %v804_v35 = vsel %vm695_vm7, %v687_v55, -inf  ;;  %v775_v55 = vrot.slane %v1706_v41, 1 }
 0x14b   : > { %v716_v15 = vadd.f32 %v715_v33, %v714_v40  ;;  %v799_v24 = vmax.f32 %v797_v54, %v798_v1 }
 0x14d   : > { %v605_v59 = vpop.trf.xlu0  ;;  %v688_v60 = vpop.trf.xlu1  ;;  %v717_v3 = vrot.slane %v716_v15, 4 }
 0x14e   : > { %v723_v20 = vsel %vm695_vm7, %v605_v59, 0.0  ;;  %v805_v13 = vsel %vm695_vm7, %v688_v60, -inf }
 0x14f   : > { %v718_v34 = vadd.f32 %v717_v3, %v716_v15  ;;  %v806_v47 = vmax.f32 %v804_v35, %v805_v13  ;;  %v791_v15 = vrot.slane %v790_v4, 2  ;;  %v784_v13 = vrot.slane %v783_v25, 1 }
 0x151   : > { %v606_v5 = vpop.trf.xlu0  ;;  %v689_v62 = vpop.trf.xlu1  ;;  %v719_v37 = vrot.slane %v718_v34, 2  ;;  %v807_v27 = vrot.slane %v806_v47, 4 }
 0x152   : > { %v724_v46 = vsel %vm695_vm7, %v606_v5, 0.0  ;;  %v813_v52 = vsel %vm695_vm7, %v689_v62, -inf  ;;  %v702_v62 = vadd.f32 %v701_v11, %v700_v6 }
 0x153   : > { %v725_v21 = vadd.f32 %v724_v46, %v723_v20  ;;  %v720_v19 = vadd.f32 %v719_v37, %v718_v34  ;;  %v808_v20 = vmax.f32 %v806_v47, %v807_v27 }
 0x154   : > { %v703_v7 = vrot.slane %v702_v62, 1 }
 0x155   : > { %v607_v10 = vpop.trf.xlu0  ;;  %v690_v16 = vpop.trf.xlu1  ;;  %v726_v22 = vrot.slane %v725_v21, 4  ;;  %v721_v42 = vrot.slane %v720_v19, 1  ;;  %v809_v54 = vrot.slane %v808_v20, 2 }
 0x156   : > { %v732_v2 = vsel %vm695_vm7, %v607_v10, 0.0  ;;  %v814_v57 = vsel %vm695_vm7, %v690_v16, -inf  ;;  %v711_v16 = vadd.f32 %v710_v28, %v709_v9  ;;  %v800_v9 = vrot.slane %v799_v24, 2 }
 0x157   : > { %v727_v58 = vadd.f32 %v726_v22, %v725_v21  ;;  %v815_v59 = vmax.f32 %v813_v52, %v814_v57  ;;  %v776_v22 = vmax.f32 %v1706_v41, %v775_v55 }
 0x159   : > { %v608_v49 = vpop.trf.xlu0  ;;  %v691_v17 = vpop.trf.xlu1  ;;  %v728_v32 = vrot.slane %v727_v58, 2  ;;  %v816_v45 = vrot.slane %v815_v59, 4 }
 0x15a   : > { %v733_v0 = vsel %vm695_vm7, %v608_v49, 0.0  ;;  %v822_v61 = vsel %vm695_vm7, %v691_v17, -inf }
 0x15b   : > { %v734_v48 = vadd.f32 %v733_v0, %v732_v2  ;;  %v729_v21 = vadd.f32 %v728_v32, %v727_v58  ;;  %v817_v2 = vmax.f32 %v815_v59, %v816_v45  ;;  %v722_v59 = vadd.f32 %v721_v42, %v720_v19 }
 0x15d   : > { %v609_v30 = vpop.trf.xlu0  ;;  %v692_v51 = vpop.trf.xlu1  ;;  %v735_v44 = vrot.slane %v734_v48, 4  ;;  %v730_v57 = vrot.slane %v729_v21, 1  ;;  %v818_v28 = vrot.slane %v817_v2, 2  ;;  %v842_v32 = vmul.f32 0.0078125, %v722_v59  ;;  %v913_v59 = vld [vmem:[%s1473_s10] sm:$0xff] }
 0x15e   : > { %v823_v14 = vsel %vm695_vm7, %v692_v51, -inf  ;;  %v741_v39 = vsel %vm695_vm7, %v609_v30, 0.0  ;;  %v792_v30 = vmax.f32 %v790_v4, %v791_v15 }
 0x15f   : > { %v736_v5 = vadd.f32 %v735_v44, %v734_v48  ;;  %v824_v63 = vmax.f32 %v822_v61, %v823_v14  ;;  %v712_v48 = vrot.slane %v711_v16, 1  ;;  %v704_v44 = vadd.f32 %v703_v7, %v702_v62 }
 0x160   : > { %v793_v47 = vrot.slane %v792_v30, 1  ;;  %v731_v1 = vadd.f32 %v730_v57, %v729_v21 }
 0x161   : > { %v610_v36 = vpop.trf.xlu0  ;;  %v693_v43 = vpop.trf.xlu1  ;;  %v737_v40 = vrot.slane %v736_v5, 2  ;;  %v825_v46 = vrot.slane %v824_v63, 4  ;;  %v713_v35 = vadd.f32 %v712_v48, %v711_v16  ;;  %v785_v16 = vmax.f32 %v783_v25, %v784_v13 }
 0x162   : > { %v742_v56 = vsel %vm695_vm7, %v610_v36, 0.0  ;;  %v831_v38 = vsel %vm695_vm7, %v693_v43, -inf  ;;  %v801_v36 = vmax.f32 %v799_v24, %v800_v9  ;;  %v794_v15 = vmax.f32 %v792_v30, %v793_v47 }
 0x163   : > { %v743_v60 = vadd.f32 %v742_v56, %v741_v39  ;;  %v738_v3 = vadd.f32 %v737_v40, %v736_v5  ;;  %v826_v8 = vmax.f32 %v824_v63, %v825_v46  ;;  %v819_v5 = vmax.f32 %v817_v2, %v818_v28 }
 0x164   : > { %v841_v50 = vmul.f32 0.0078125, %v713_v35  ;;  %v802_v4 = vrot.slane %v801_v36, 1 }
 0x165   : > { %v744_v26 = vrot.slane %v743_v60, 4  ;;  %v611_v31 = vpop.trf.xlu0  ;;  %v694_v23 = vpop.trf.xlu1  ;;  %v739_v14 = vrot.slane %v738_v3, 1  ;;  %v827_v43 = vrot.slane %v826_v8, 2  ;;  %v820_v24 = vrot.slane %v819_v5, 1 }
 0x166   : > { %v832_v10 = vsel %vm695_vm7, %v694_v23, -inf  ;;  %v750_v0 = vsel %vm695_vm7, %v611_v31, 0.0 }
 0x167   : > { %v745_v33 = vadd.f32 %v744_v26, %v743_v60  ;;  %v833_v18 = vmax.f32 %v831_v38, %v832_v10  ;;  %v810_v60 = vmax.f32 %v808_v20, %v809_v54  ;;  %v740_v26 = vadd.f32 %v739_v14, %v738_v3 }
 0x168   : > { %v828_v31 = vmax.f32 %v826_v8, %v827_v43  ;;  %v840_v10 = vmul.f32 0.0078125, %v704_v44  ;;  %v849_v38 = vadd.f32 %v841_v50, %v785_v16  ;;  %v821_v25 = vmax.f32 %v819_v5, %v820_v24 }
 0x169   : > { %v746_v49 = vrot.slane %v745_v33, 2  ;;  %v612_v17 = vpop.trf.xlu0  ;;  %v834_v12 = vrot.slane %v833_v18, 4  ;;  %v811_v45 = vrot.slane %v810_v60, 1 }
 0x16a   : > { %v751_v6 = vsel %vm695_vm7, %v612_v17, 0.0  ;;  %v829_v17 = vrot.slane %v828_v31, 1  ;;  %v848_v2 = vadd.f32 %v840_v10, %v776_v22  ;;  %v857_v8 = vmul.f32 0.5, %v849_v38 }
 0x16b   : > { %v752_v29 = vadd.f32 %v751_v6, %v750_v0  ;;  %v747_v51 = vadd.f32 %v746_v49, %v745_v33  ;;  %v835_v56 = vmax.f32 %v833_v18, %v834_v12  ;;  %v843_v33 = vmul.f32 0.0078125, %v731_v1 }
 0x16c   : > { %v844_v49 = vmul.f32 0.0078125, %v740_v26  ;;  %v803_v18 = vmax.f32 %v801_v36, %v802_v4  ;;  %v850_v6 = vadd.f32 %v842_v32, %v794_v15  ;;  %v812_v7 = vmax.f32 %v810_v60, %v811_v45 }
 0x16d   : > { %v753_v53 = vrot.slane %v752_v29, 4  ;;  %v613_v11 = vpop.trf.xlu0  ;;  %v748_v52 = vrot.slane %v747_v51, 1  ;;  %v836_v37 = vrot.slane %v835_v56, 2  ;;  %v830_v3 = vmax.f32 %v828_v31, %v829_v17 }
 0x16e   : > { %v759_v41 = vsel %vm695_vm7, %v613_v11, 0.0  ;;  %v852_v9 = vadd.f32 %v844_v49, %v812_v7  ;;  %v858_v30 = vmul.f32 0.5, %v850_v6  ;;  %v856_v13 = vmul.f32 0.5, %v848_v2 }
 0x16f   : > { %v754_v34 = vadd.f32 %v753_v53, %v752_v29  ;;  %v749_v23 = vadd.f32 %v748_v52, %v747_v51  ;;  %v837_v20 = vmax.f32 %v835_v56, %v836_v37  ;;  %v851_v29 = vadd.f32 %v843_v33, %v803_v18 }
 0x170   : > { %v860_v44 = vmul.f32 0.5, %v852_v9  ;;  %v916_v60 = vstv %s912_s22 }
 0x171   : > { %v755_v39 = vrot.slane %v754_v34, 2  ;;  %v614_v58 = vpop.trf.xlu0  ;;  %v845_v19 = vmul.f32 0.0078125, %v749_v23  ;;  %v838_v51 = vrot.slane %v837_v20, 1  ;;  %v859_v42 = vmul.f32 0.5, %v851_v29 }
 0x172   : > { %v760_v61 = vsel %vm695_vm7, %v614_v58, 0.0 }
 0x173   : > { %v756_v63 = vadd.f32 %v755_v39, %v754_v34  ;;  %v761_v55 = vadd.f32 %v760_v61, %v759_v41  ;;  %v853_v11 = vadd.f32 %v845_v19, %v821_v25  ;;  %v839_v57 = vmax.f32 %v837_v20, %v838_v51  ;;  %v914_v61 = vld [vmem:[%s1473_s10 + $0x8] sm:$0xff] }
 0x174   : > { %v872_v34 = vsel %vm552_vm0, %v857_v8, %v856_v13  ;;  %v917_v41 = vmul.f32 %v916_v60, %v913_v59 }
 0x175   : > { %v757_v62 = vrot.slane %v756_v63, 1  ;;  %v762_v27 = vrot.slane %v761_v55, 4  ;;  %v861_v22 = vmul.f32 0.5, %v853_v11  ;;  %v873_v36 = vsel %vm554_vm1, %v858_v30, %v872_v34 }
 0x176   : > { %v874_v43 = vsel %vm556_vm2, %v859_v42, %v873_v36 }
 0x177   : > { %v758_v40 = vadd.f32 %v757_v62, %v756_v63  ;;  %v763_v46 = vadd.f32 %v762_v27, %v761_v55  ;;  %v875_v47 = vsel %vm558_vm3, %v860_v44, %v874_v43  ;;  %v918_v63 = vmul.f32 %v916_v60, %v914_v61  ;;  %v915_v55 = vld [vmem:[%s1473_s10 + $0x10] sm:$0xff] }
 0x178   : > { %v876_v39 = vsel %vm560_vm4, %v861_v22, %v875_v47  ;;  %v919_v26 = vmul.f32 %v916_v60, %v915_v55 }
 0x179   : > { %v764_v0 = vrot.slane %v763_v46, 2  ;;  %v846_v21 = vmul.f32 0.0078125, %v758_v40 }
 0x17b   : > { %v765_v48 = vadd.f32 %v764_v0, %v763_v46  ;;  %v854_v12 = vadd.f32 %v846_v21, %v830_v3 }
 0x17d   : > { %v766_v53 = vrot.slane %v765_v48, 1  ;;  %v862_v35 = vmul.f32 0.5, %v854_v12 }
 0x17f   : > { %v767_v54 = vadd.f32 %v766_v53, %v765_v48  ;;  %v877_v56 = vsel %vm562_vm5, %v862_v35, %v876_v39 }
 0x181   : > { %v847_v28 = vmul.f32 0.0078125, %v767_v54 }
 0x183   : > { %v855_v14 = vadd.f32 %v847_v28, %v839_v57 }
 0x185   : > { %v863_v52 = vmul.f32 0.5, %v855_v14 }
 0x187   : > { %v878_v58 = vsel %vm564_vm6, %v863_v52, %v877_v56 }
 0x188   : > { %880 = vxpose.xlu0.b32.start.end [1/1] (short) (narrow) %v878_v58, 24 }
 0x208   : > { %v896_v1 = vpop.trf.xlu0 }
 0x209   : > { %v920_v5 = vadd.f32 %v917_v41, %v896_v1 }
 0x20b   : > { %924 = vst.msk [vmem:[%s215_s6] sm:$0xff] %vm923_vm8, %v920_v5 }
 0x20c   : > { %v897_v50 = vpop.trf.xlu0 }
 0x20d   : > { %v921_v4 = vadd.f32 %v918_v63, %v897_v50 }
 0x20f   : > { %925 = vst.msk [vmem:[%s215_s6 + $0x8] sm:$0xff] %vm923_vm8, %v921_v4 }
 0x210   : > { %v898_v31 = vpop.trf.xlu0 }
 0x211   : > { %v922_v23 = vadd.f32 %v919_v26, %v898_v31 }
 0x213   : > { %926 = vst.msk [vmem:[%s215_s6 + $0x10] sm:$0xff] %vm923_vm8, %v922_v23 }
 0x214   : > { %1210 = shalt.err (!%p1207_p7)
}
 0x215   : > { %s1211_s20 = scalar_lea.hbm %s1746_s11, 384  ;;  %s1215_s25 = scalar_lea.hbm %s1793_s3, 1536 }
 0x216   : > { %p1212_p11 = scmp.ne.s32.totalorder %s1746_s11, %s1211_s20  ;;  %p1216_p2 = scmp.lt.u32.totalorder %s1746_s11, %s1793_s3 }
 0x217   : > { %p1217_p3 = scmp.lt.u32.totalorder %s1215_s25, %s1211_s20  ;;  %p1219_p8 = scmp.lt.u32.totalorder %s1211_s20, %s1746_s11 }
 0x218   : > { %p1213_p13 = pnand %p1212_p11, %p1812_p9 }
 0x219   : > { %p1218_p6 = por %p1217_p3, %p1216_p2 }
 0x21a   : > { %p1214_p1 = pneg %p1213_p13 }
 0x21b   : > { %p1220_p5 = por %p1219_p8, %p1218_p6 }
 0x21d   : > { %p1221_p10 = pnand %p1220_p5, %p1214_p1 }
 0x21f   : > { %1224 = shalt.err (!%p1221_p10)
}
 0x220   : > { %s1279_s22 = smov 128   ;;  %s1280_s6 = smov 8  }
 0x221   : > { %1064 = dma.vmem_to_hbm [thread:$0]  (%p1812_p9), %s1740_s26, 384, %s1746_s11, %s928_s17, %s1279_s22, %s1279_s22, %s1280_s6  }
 0x222 PF: > { %p1086_p4 = scmp.ge.s32.totalorder %s1271_s15, 2  ;;  %s956_s7 = sand.u32 1, %s1259_s12  }
 0x223   : > { %p1813_p12 = scmp.ne.s32.totalorder %s1801_s24, 0  ;;  %s957_s8 = scalar_lea.sflag [#allocation4], %s956_s7 }
 0x225   : > { %p1078_p0 = pnand %p1086_p4, %p1813_p12 }
 0x227   : > { %1254 = dma.done.wait (!%p1078_p0), %s957_s8, 384  }
 0x228   : > { %1256 = vsyncadd (!%p1078_p0), %s957_s8, 4294966912  ;;  %p18_p7 = scmp.ge.s32.totalorder %s1326_s18, 6   ;;  %s1814_s12 = smov %s1263_s13 }
 0x229   : > { %s1815_s13 = smov %s1267_s14  ;;  %s1816_s14 = smov %s1338_s21 }
 0x22a   : > { %s1817_s15 = smov %s1326_s18  ;;  %20 = sbr.rel (!%p18_p7) target bundleno = 7 (0x7), region = 87 }
 0x231   :  { %962 = vsyncpa [#allocation3], 1 }
 0x232   :  { %964 = vsyncpa [#allocation3 + $0x1], 1 }
 0x233   :  { %965 = vsyncpa [#allocation8], 1 }
 0x234   :  { %967 = vsyncpa [#allocation8 + $0x1], 1 }
 0x235   :  { %968 = vsyncpa [#allocation4], 1 }
 0x236   :  { %970 = vsyncpa [#allocation4 + $0x1], 1 }
 0x237   :  { %971 = vsyncpa [#allocation5], 1 }
 0x238   :  { %973 = vsyncpa [#allocation5 + $0x1], 1 }

</bundles_post_ra>
